<compile_context>
chip_gen: v7x
topology: tpu7x:2x2x1
jax: 0.10.0
libtpu: 0.0.40
codegen_flags: <defaults>
</compile_context>

<pallas_src>
import jax
import jax.numpy as jnp
from jax import lax
from jax.experimental import pallas as pl
from jax.experimental.pallas import tpu as pltpu

NEG_SLOPE = 0.2                # PyG GATConv default leaky-relu slope
NEG_INF = -1e30                # finite "minus infinity" (NaN-free pads)
LANE = 128                     # TPU lane width; feature dims padded to this
TILE_N_MAX = 256               # node tile (dst & src); clamped for small N
VMEM_LIMIT = 32 * 1024 * 1024  # safe on v5e/v6e (128 MiB) and v7x (64 MiB)


def _pad_to(x, m):
    return ((x + m - 1) // m) * m


# ----------------------------- Pallas kernels ------------------------------

def linear_kernel(x_ref, w_ref, ad_ref, as_ref, h_ref, ed_ref, es_ref):
    """Per node tile: h = x @ W (bf16 out) plus the hoisted attention-logit
    halves e_dst = x @ (W a_dst) as a column and e_src = x @ (W a_src) as a
    row (so the N^2 attention loop never touches the MXU for them)."""
    x = x_ref[...].astype(jnp.bfloat16)
    h = jnp.dot(x, w_ref[...], preferred_element_type=jnp.float32)
    h_ref[...] = h.astype(jnp.bfloat16)
    ed_ref[...] = jnp.dot(x, ad_ref[...],
                          preferred_element_type=jnp.float32)          # (T, 1)
    es_ref[...] = lax.dot_general(as_ref[...], x,
                                  (((0,), (1,)), ((), ())),
                                  preferred_element_type=jnp.float32)  # (1, T)


def gat_attn_kernel(cnt_ref, tbl_ref, e_dst_ref, e_src_ref, h_src_ref,
                    mask_ref, b_ref, o_ref, m_sc, l_sc, acc_sc):
    """Online-softmax GAT attention + aggregation for one (dst, src) tile pair.
    Only non-empty src tiles (from the prefetched table) do any work."""
    i = pl.program_id(0)
    k = pl.program_id(1)

    @pl.when(k == 0)
    def _():
        m_sc[...] = jnp.full_like(m_sc, NEG_INF)
        l_sc[...] = jnp.zeros_like(l_sc)
        acc_sc[...] = jnp.zeros_like(acc_sc)

    @pl.when(k < cnt_ref[i])
    def _():
        # e[dst, src] = leaky_relu(e_dst[dst] + e_src[src]), masked to edges.
        s = e_dst_ref[...] + e_src_ref[...]            # (Td,1)+(1,Ts)->(Td,Ts)
        s = jnp.maximum(s, NEG_SLOPE * s)              # leaky relu, slope<1
        adj = mask_ref[...].astype(jnp.float32)        # int8 {0,1} -> f32
        s = jnp.where(adj > 0.0, s, NEG_INF)

        # flash-style online masked softmax over the src axis (all f32).
        m_prev = m_sc[...]
        m_new = jnp.maximum(m_prev, jnp.max(s, axis=1, keepdims=True))
        alpha = jnp.exp(m_prev - m_new)
        p = jnp.exp(s - m_new)
        l_sc[...] = alpha * l_sc[...] + jnp.sum(p, axis=1, keepdims=True)
        acc_sc[...] = alpha * acc_sc[...] + jnp.dot(
            p.astype(jnp.bfloat16), h_src_ref[...],
            preferred_element_type=jnp.float32)
        m_sc[...] = m_new

    @pl.when(k == pl.num_programs(1) - 1)
    def _():
        out = acc_sc[...] * pl.reciprocal(l_sc[...]) + b_ref[...]
        # Reference applies ReLU after every conv layer (its guard
        # `index != num_conv_layers` is always true); dropout(p=0.5) is the
        # identity at inference and intentionally not materialized.
        o_ref[...] = jnp.maximum(out, 0.0).astype(o_ref.dtype)


def head_kernel(x_ref, mbias_ref, w1_ref, b1_ref, w2_ref, b2_ref, o_ref,
                pool_sc):
    """Tiled global_max_pool (running per-graph max) + relu(lin) + output."""
    i = pl.program_id(0)

    @pl.when(i == 0)
    def _():
        pool_sc[...] = jnp.full_like(pool_sc, NEG_INF)

    x = x_ref[...].astype(jnp.float32)     # (Tn, C)
    mb = mbias_ref[...]                    # (Tn, G) additive bias (0 / -1e30)
    prev = pool_sc[...]
    rows = []
    # TODO(synk): replace the static G_pad unroll with a tiled / vectorized
    # masked reduction once the graph batch grows beyond ~16.
    for g in range(prev.shape[0]):
        rows.append(jnp.max(x + mb[:, g:g + 1], axis=0, keepdims=True))
    pool_sc[...] = jnp.maximum(prev, jnp.concatenate(rows, axis=0))

    @pl.when(i == pl.num_programs(0) - 1)
    def _():
        # Conv outputs are ReLU'd (>= 0), so clamping at 0 only cleans up the
        # padded graph rows (keeps -1e30 out of the MLP -> no inf anywhere).
        pool = jnp.maximum(pool_sc[...], 0.0)
        h = jnp.dot(pool, w1_ref[...],
                    preferred_element_type=jnp.float32) + b1_ref[...]
        h = jnp.maximum(h, 0.0)
        o_ref[...] = jnp.dot(h, w2_ref[...],
                             preferred_element_type=jnp.float32) + b2_ref[...]


# ------------------------------ wrappers ------------------------------------

def gat_linear(x, w, wa_dst, wa_src, tile):
    n_pad, f_pad = x.shape
    c_pad = w.shape[1]
    return pl.pallas_call(
        linear_kernel,
        out_shape=(jax.ShapeDtypeStruct((n_pad, c_pad), jnp.bfloat16),
                   jax.ShapeDtypeStruct((n_pad, 1), jnp.float32),
                   jax.ShapeDtypeStruct((1, n_pad), jnp.float32)),
        grid_spec=pltpu.PrefetchScalarGridSpec(
            num_scalar_prefetch=0,
            grid=(n_pad // tile,),
            in_specs=[pl.BlockSpec((tile, f_pad), lambda i: (i, 0)),
                      pl.BlockSpec((f_pad, c_pad), lambda i: (0, 0)),
                      pl.BlockSpec((f_pad, 1), lambda i: (0, 0)),
                      pl.BlockSpec((f_pad, 1), lambda i: (0, 0))],
            out_specs=[pl.BlockSpec((tile, c_pad), lambda i: (i, 0)),
                       pl.BlockSpec((tile, 1), lambda i: (i, 0)),
                       pl.BlockSpec((1, tile), lambda i: (0, i))]),
        compiler_params=pltpu.CompilerParams(
            dimension_semantics=("parallel",),
            vmem_limit_bytes=VMEM_LIMIT),
    )(x, w, wa_dst, wa_src)


def gat_conv(h, e_dst, e_src, adj_mask, counts, table, kmax, b, tile):
    n_pad, c_pad = h.shape
    nt = n_pad // tile
    return pl.pallas_call(
        gat_attn_kernel,
        out_shape=jax.ShapeDtypeStruct((n_pad, c_pad), jnp.bfloat16),
        grid_spec=pltpu.PrefetchScalarGridSpec(
            num_scalar_prefetch=2,          # counts, table -> SMEM
            grid=(nt, kmax),                # (dst tiles, non-empty src tiles)
            in_specs=[
                pl.BlockSpec((tile, 1),
                             lambda i, k, cnt, tbl: (i, 0)),           # e_dst
                pl.BlockSpec((1, tile),
                             lambda i, k, cnt, tbl: (0, tbl[i, k])),   # e_src
                pl.BlockSpec((tile, c_pad),
                             lambda i, k, cnt, tbl: (tbl[i, k], 0)),   # h_src
                pl.BlockSpec((tile, tile),
                             lambda i, k, cnt, tbl: (i, tbl[i, k])),   # mask
                pl.BlockSpec((1, c_pad),
                             lambda i, k, cnt, tbl: (0, 0)),           # bias
            ],
            out_specs=pl.BlockSpec((tile, c_pad),
                                   lambda i, k, cnt, tbl: (i, 0)),
            scratch_shapes=[pltpu.VMEM((tile, 1), jnp.float32),      # run. max
                            pltpu.VMEM((tile, 1), jnp.float32),      # denom
                            pltpu.VMEM((tile, c_pad), jnp.float32)]  # accum
        ),
        compiler_params=pltpu.CompilerParams(
            dimension_semantics=("parallel", "arbitrary"),
            vmem_limit_bytes=VMEM_LIMIT),
    )(counts, table, e_dst, e_src, h, adj_mask, b)


def gat_head(x, mbias, w1, b1, w2, b2, tile):
    n_pad, c_pad = x.shape
    g_pad = mbias.shape[1]
    l_pad = w1.shape[1]
    o_pad = w2.shape[1]
    return pl.pallas_call(
        head_kernel,
        out_shape=jax.ShapeDtypeStruct((g_pad, o_pad), jnp.float32),
        grid_spec=pltpu.PrefetchScalarGridSpec(
            num_scalar_prefetch=0,
            grid=(n_pad // tile,),
            in_specs=[
                pl.BlockSpec((tile, c_pad), lambda i: (i, 0)),
                pl.BlockSpec((tile, g_pad), lambda i: (i, 0)),
                pl.BlockSpec((c_pad, l_pad), lambda i: (0, 0)),
                pl.BlockSpec((1, l_pad), lambda i: (0, 0)),
                pl.BlockSpec((l_pad, o_pad), lambda i: (0, 0)),
                pl.BlockSpec((1, o_pad), lambda i: (0, 0)),
            ],
            out_specs=pl.BlockSpec((g_pad, o_pad), lambda i: (0, 0)),
            scratch_shapes=[pltpu.VMEM((g_pad, c_pad), jnp.float32)]),
        compiler_params=pltpu.CompilerParams(
            dimension_semantics=("arbitrary",),
            vmem_limit_bytes=VMEM_LIMIT),
    )(x, mbias, w1, b1, w2, b2)


# ------------------------------ parameters -----------------------------------

def init_params(key, hparams):
    heads = hparams.get('heads', 1)
    # NB: the reference module only shape-checks for heads == 1 anyway
    # (self.lin expects conv_size inputs, not heads*conv_size).
    assert heads == 1, "multi-head GATConv (concat) not implemented"
    f_in = hparams['num_node_features']
    c = hparams['conv_size']
    lin = hparams['lin_size']
    out = hparams['output_size']
    f_in_pad = _pad_to(f_in, LANE)
    c_pad = _pad_to(c, LANE)
    lin_pad = _pad_to(lin, LANE)
    out_pad = _pad_to(out, LANE)

    convs = []
    in_dim, in_pad = f_in, f_in_pad
    for _ in range(hparams['num_conv_layers']):
        key, k1, k2, k3 = jax.random.split(key, 4)
        w = jnp.zeros((in_pad, c_pad), jnp.float32).at[:in_dim, :c].set(
            jax.random.normal(k1, (in_dim, c), jnp.float32) * 0.2)
        a_src = jnp.zeros((c_pad, 1), jnp.float32).at[:c, :].set(
            jax.random.normal(k2, (c, 1), jnp.float32) * 0.2)
        a_dst = jnp.zeros((c_pad, 1), jnp.float32).at[:c, :].set(
            jax.random.normal(k3, (c, 1), jnp.float32) * 0.2)
        convs.append(dict(w=w, a_src=a_src, a_dst=a_dst,
                          b=jnp.zeros((1, c_pad), jnp.float32)))
        in_dim, in_pad = heads * c, c_pad

    key, k1, k2 = jax.random.split(key, 3)
    lin_w = jnp.zeros((c_pad, lin_pad), jnp.float32).at[:c, :lin].set(
        jax.random.normal(k1, (c, lin), jnp.float32) * 0.2)
    out_w = jnp.zeros((lin_pad, out_pad), jnp.float32).at[:lin, :out].set(
        jax.random.normal(k2, (lin, out), jnp.float32) * 0.2)
    return dict(convs=convs,
                lin_w=lin_w, lin_b=jnp.zeros((1, lin_pad), jnp.float32),
                out_w=out_w, out_b=jnp.zeros((1, out_pad), jnp.float32),
                output_size=out)


# ------------------------------- forward -------------------------------------

def gat_forward(params, x, edge_index, batch, num_graphs):
    n, f_in = x.shape
    f_in_pad = params['convs'][0]['w'].shape[0]
    tile = min(TILE_N_MAX, _pad_to(n, LANE))
    n_pad = _pad_to(n, tile)
    nt = n_pad // tile
    g_pad = _pad_to(max(num_graphs, 1), 8)

    # ---- plain-JAX glue: densify + pad (layout plumbing, not the hot path) --
    x_p = jnp.zeros((n_pad, f_in_pad), jnp.float32).at[:n, :f_in].set(x)

    # int8 adjacency mask[dst, src] in {0,1}: edges src->dst plus self-loops
    # (PyG GATConv default add_self_loops=True).  Self-loops on padded rows
    # keep the online softmax denominator non-zero there.
    adj = jnp.zeros((n_pad, n_pad), jnp.int8)
    adj = adj.at[edge_index[1], edge_index[0]].set(1)
    adj = jnp.maximum(adj, jnp.eye(n_pad, dtype=jnp.int8))

    # Per-dst-tile count + table of non-empty src tiles: block-diagonal
    # batched graphs -> most (dst, src) tile pairs are fully masked and the
    # attention kernel never streams or exponentiates them.
    nonempty = jnp.any(adj.reshape(nt, tile, nt, tile) != 0, axis=(1, 3))
    counts = jnp.sum(nonempty, axis=1).astype(jnp.int32)           # (nt,) >= 1
    tid = jnp.arange(nt, dtype=jnp.int32)
    keys = jnp.where(nonempty, tid[None, :], nt)
    skeys = jnp.sort(keys, axis=1)
    last = jnp.take_along_axis(skeys, (counts - 1)[:, None], axis=1)
    table = jnp.where(tid[None, :] < counts[:, None], skeys, last)
    table = table.astype(jnp.int32)
    # static k extent (eager here; under jit use `nt` as the upper bound)
    kmax = int(counts.max())

    # graph-membership additive bias (N_pad, G_pad): 0 if node in graph else -1e30
    node_graph = jnp.full((n_pad,), -1, jnp.int32).at[:n].set(batch)
    mbias = jnp.where(
        node_graph[:, None] == jnp.arange(g_pad, dtype=jnp.int32)[None, :],
        0.0, NEG_INF).astype(jnp.float32)

    # TODO(synk): fuse the per-layer linear into the attention pallas_call
    # (k==0 prologue) to drop the remaining h HBM round trip for tiny graphs.
    h = x_p
    for conv in params['convs']:
        w_bf = conv['w'].astype(jnp.bfloat16)
        wa_dst = jnp.dot(conv['w'], conv['a_dst']).astype(jnp.bfloat16)
        wa_src = jnp.dot(conv['w'], conv['a_src']).astype(jnp.bfloat16)
        h_lin, e_dst, e_src = gat_linear(h, w_bf, wa_dst, wa_src, tile)
        h = gat_conv(h_lin, e_dst, e_src, adj, counts, table, kmax,
                     conv['b'], tile)

    out = gat_head(h, mbias, params['lin_w'], params['lin_b'],
                   params['out_w'], params['out_b'], tile)
    return out[:num_graphs, :params['output_size']]


# ------------------------------- example ------------------------------------

if __name__ == "__main__":
    hparams = dict(num_node_features=8, conv_size=32, num_conv_layers=2,
                   heads=1, lin_size=16, output_size=4)

    key = jax.random.PRNGKey(0)
    key, kx = jax.random.split(key)

    # Two graphs, 8 nodes each (N=16). Each graph is a bidirectional ring.
    n_per, num_graphs = 8, 2
    n = n_per * num_graphs
    src, dst = [], []
    for g in range(num_graphs):
        base = g * n_per
        for i in range(n_per):
            a, b = base + i, base + (i + 1) % n_per
            src += [a, b]
            dst += [b, a]
    edge_index = jnp.array([src, dst], dtype=jnp.int32)                 # (2, 32)
    batch = jnp.repeat(jnp.arange(num_graphs, dtype=jnp.int32), n_per)  # (16,)
    x = jax.random.normal(kx, (n, hparams['num_node_features']), jnp.float32)
    pos = None  # unused by the reference forward

    params = init_params(key, hparams)
    out = gat_forward(params, x, edge_index, batch, num_graphs)
    out = jax.block_until_ready(out)
    assert out.shape == (num_graphs, hparams['output_size'])
    assert bool(jnp.all(jnp.isfinite(out)))
    print("KERNEL_OK")
</pallas_src>

<mosaic_0001>
module attributes {stable_mosaic.version = 11 : i64} {
  func.func @linear_kernel(%arg0: i32, %arg1: memref<128x128xf32, #tpu.memory_space<vmem>>, %arg2: memref<128x128xbf16, #tpu.memory_space<vmem>>, %arg3: memref<128x1xbf16, #tpu.memory_space<vmem>>, %arg4: memref<128x1xbf16, #tpu.memory_space<vmem>>, %arg5: memref<128x128xbf16, #tpu.memory_space<vmem>>, %arg6: memref<128x1xf32, #tpu.memory_space<vmem>>, %arg7: memref<1x128xf32, #tpu.memory_space<vmem>>) attributes {dimension_semantics = [#tpu.dimension_semantics<parallel>], iteration_bounds = array<i64: 1>, scalar_prefetch = 0 : i64, scratch_operands = 0 : i64, tpu.core_type = #tpu.core_type<tc>, window_params = [{transform_indices = @transform_0, window_bounds = array<i64: 128, 128>}, {pipeline_mode = #tpu.pipeline_mode<synchronous>, transform_indices = @transform_1, window_bounds = array<i64: 128, 128>}, {pipeline_mode = #tpu.pipeline_mode<synchronous>, transform_indices = @transform_2, window_bounds = array<i64: 128, 1>}, {pipeline_mode = #tpu.pipeline_mode<synchronous>, transform_indices = @transform_3, window_bounds = array<i64: 128, 1>}, {transform_indices = @transform_4, window_bounds = array<i64: 128, 128>}, {transform_indices = @transform_5, window_bounds = array<i64: 128, 1>}, {transform_indices = @transform_6, window_bounds = array<i64: 1, 128>}]} {
    %c0 = arith.constant 0 : index
    %c0_0 = arith.constant 0 : index
    %0 = vector.load %arg1[%c0, %c0_0] : memref<128x128xf32, #tpu.memory_space<vmem>>, vector<128x128xf32>
    %1 = arith.truncf %0 : vector<128x128xf32> to vector<128x128xbf16>
    %c0_1 = arith.constant 0 : index
    %c0_2 = arith.constant 0 : index
    %2 = vector.load %arg2[%c0_1, %c0_2] : memref<128x128xbf16, #tpu.memory_space<vmem>>, vector<128x128xbf16>
    %cst = arith.constant dense<0.000000e+00> : vector<128x128xf32>
    %3 = tpu.matmul %1, %2, %cst {dimension_numbers = #tpu.dot_dimension_numbers<[1], [0], [0], [1], [0, 0, 1, 1], [], []>} : vector<128x128xbf16>, vector<128x128xbf16>, vector<128x128xf32> -> vector<128x128xf32>
    %4 = arith.truncf %3 : vector<128x128xf32> to vector<128x128xbf16>
    %c0_3 = arith.constant 0 : index
    %c0_4 = arith.constant 0 : index
    %5 = vector.load %arg5[%c0_3, %c0_4] : memref<128x128xbf16, #tpu.memory_space<vmem>>, vector<128x128xbf16>
    tpu.vector_store %arg5[%c0_3, %c0_4], %4 {strides = array<i32>} : memref<128x128xbf16, #tpu.memory_space<vmem>>, vector<128x128xbf16>,
    %c0_5 = arith.constant 0 : index
    %c0_6 = arith.constant 0 : index
    %6 = vector.load %arg3[%c0_5, %c0_6] : memref<128x1xbf16, #tpu.memory_space<vmem>>, vector<128x1xbf16>
    %cst_7 = arith.constant dense<0.000000e+00> : vector<128x1xf32>
    %7 = tpu.matmul %1, %6, %cst_7 {dimension_numbers = #tpu.dot_dimension_numbers<[1], [0], [0], [1], [0, 0, 1, 1], [], []>} : vector<128x128xbf16>, vector<128x1xbf16>, vector<128x1xf32> -> vector<128x1xf32>
    %c0_8 = arith.constant 0 : index
    %c0_9 = arith.constant 0 : index
    %8 = vector.load %arg6[%c0_8, %c0_9] : memref<128x1xf32, #tpu.memory_space<vmem>>, vector<128x1xf32>
    tpu.vector_store %arg6[%c0_8, %c0_9], %7 {strides = array<i32>} : memref<128x1xf32, #tpu.memory_space<vmem>>, vector<128x1xf32>,
    %c0_10 = arith.constant 0 : index
    %c0_11 = arith.constant 0 : index
    %9 = vector.load %arg4[%c0_10, %c0_11] : memref<128x1xbf16, #tpu.memory_space<vmem>>, vector<128x1xbf16>
    %cst_12 = arith.constant dense<0.000000e+00> : vector<1x128xf32>
    %10 = tpu.matmul %9, %1, %cst_12 {dimension_numbers = #tpu.dot_dimension_numbers<[0], [1], [1], [0], [0, 1, 1, 0], [], []>} : vector<128x1xbf16>, vector<128x128xbf16>, vector<1x128xf32> -> vector<1x128xf32>
    %c0_13 = arith.constant 0 : index
    %c0_14 = arith.constant 0 : index
    %11 = vector.load %arg7[%c0_13, %c0_14] : memref<1x128xf32, #tpu.memory_space<vmem>>, vector<1x128xf32>
    tpu.vector_store %arg7[%c0_13, %c0_14], %10 {strides = array<i32>} : memref<1x128xf32, #tpu.memory_space<vmem>>, vector<1x128xf32>,
    return
  }
  func.func @transform_0(%arg0: i32) -> (i32, i32) {
    %c0_i32 = arith.constant 0 : i32
    %c0_i32_0 = arith.constant 0 : i32
    return %arg0, %c0_i32 : i32, i32
  }
  func.func @transform_1(%arg0: i32) -> (i32, i32) {
    %c0_i32 = arith.constant 0 : i32
    %c0_i32_0 = arith.constant 0 : i32
    %c0_i32_1 = arith.constant 0 : i32
    return %c0_i32, %c0_i32_0 : i32, i32
  }
  func.func @transform_2(%arg0: i32) -> (i32, i32) {
    %c0_i32 = arith.constant 0 : i32
    %c0_i32_0 = arith.constant 0 : i32
    %c0_i32_1 = arith.constant 0 : i32
    return %c0_i32, %c0_i32_0 : i32, i32
  }
  func.func @transform_3(%arg0: i32) -> (i32, i32) {
    %c0_i32 = arith.constant 0 : i32
    %c0_i32_0 = arith.constant 0 : i32
    %c0_i32_1 = arith.constant 0 : i32
    return %c0_i32, %c0_i32_0 : i32, i32
  }
  func.func @transform_4(%arg0: i32) -> (i32, i32) {
    %c0_i32 = arith.constant 0 : i32
    %c0_i32_0 = arith.constant 0 : i32
    return %arg0, %c0_i32 : i32, i32
  }
  func.func @transform_5(%arg0: i32) -> (i32, i32) {
    %c0_i32 = arith.constant 0 : i32
    %c0_i32_0 = arith.constant 0 : i32
    return %arg0, %c0_i32 : i32, i32
  }
  func.func @transform_6(%arg0: i32) -> (i32, i32) {
    %c0_i32 = arith.constant 0 : i32
    %c0_i32_0 = arith.constant 0 : i32
    return %c0_i32, %arg0 : i32, i32
  }
}

</mosaic_0001>

<bundles_post_ra>
// kernel: tpu_custom_call.1
= control target key start
LH: loop header
LB: loop body
LE: loop exit
PB: predicated region body
PF: predicated region fallthrough
CT: control target
= control target key end

     0   :  { %12 = vsyncpa [#allocation3], 0  ;;  %s1230_s0 = inlined_call_operand.vmem [shape: f32[128,128], index: 0, kind: input, shape index: {}]   ;;  %s1231_s1 = inlined_call_operand.hbm [shape: bf16[128,128], index: 1, kind: input, shape index: {}]   ;;  %s1232_s2 = inlined_call_operand.vmem [shape: bf16[128,1], index: 2, kind: input, shape index: {}]   ;;  %s1233_s3 = inlined_call_operand.vmem [shape: bf16[128,1], index: 3, kind: input, shape index: {}]   ;;  %s1234_s4 = inlined_call_operand.hbm [shape: bf16[128,128], index: 4, kind: output, shape index: {0}]   ;;  %s1235_s5 = inlined_call_operand.vmem [shape: f32[128,1], index: 5, kind: output, shape index: {1}]   ;;  %s1236_s6 = inlined_call_operand.hbm [shape: f32[1,128], index: 6, kind: output, shape index: {2}]  }
   0x1   :  { %13 = vsyncpa [#allocation4], 0 }
   0x2   :  { %14 = vsyncpa [#allocation7], 0  ;;  %s967_s21 = smov [#allocation2]   ;;  %s895_s25 = scalar_lea.hbm %s1231_s1, 1024 }
   0x3   :  { %s22_s22 = sshll.u32 %s967_s21, 4  ;;  %p896_p0 = scmp.ne.s32.totalorder %s1231_s1, %s895_s25  ;;  %s23_s22 = int_to_ptr.vmem [resolvable:$true] %s22_s22 }
   0x4   :  { %p899_p1 = scmp.lt.u32.totalorder %s895_s25, %s1231_s1 }
   0x6   :  { %p901_p2 = pnand %p899_p1, %p896_p0 }
   0x8   :  { %904 = shalt.err (!%p901_p2)
}
   0x9   :  { %s905_s30 = scalar_lea.vmem %s23_s22, 1024  ;;  %p910_p4 = scmp.lt.s32.totalorder %s23_s22, %s23_s22 }
   0xa   :  { %p906_p3 = scmp.ne.s32.totalorder %s23_s22, %s905_s30  ;;  %p911_p5 = scmp.lt.s32.totalorder %s905_s30, %s905_s30 }
   0xc   :  { %p912_p6 = por %p911_p5, %p910_p4 }
   0xe   :  { %p913_p7 = pnand %p912_p6, %p906_p3 }
  0x10   :  { %916 = shalt.err (!%p913_p7)
}
  0x11   :  { %s968_s7 = smov 64   ;;  %s969_s8 = smov 4  }
  0x12   :  { %28 = dma.hbm_to_vmem [thread:$0]  %s1231_s1, 1024, %s23_s22, [#allocation3], %s968_s7, %s968_s7, %s969_s8  }
  0x13   :  { %961 = dma.done.wait [#allocation3], 1024  }
  0x14   :  { %962 = vsyncadd [#allocation3], 4294966272  ;;  %v970_v0 = vmov 0.0   ;;  %vm971_vm0 = vmmov 0   ;;  %v871_v1 = vld [vmem:[%s1233_s3] sm:$0xff]   ;;  %v872_v2 = vld [vmem:[%s1233_s3 + $0x8] sm:$0xff]  }
  0x15   :  { %844 = vmatprep.subr.bf16.mxu0 %v970_v0  ;;  %860 = vmatprep.mubr.msk.bf16.mxu0 %vm971_vm0, %v970_v0  ;;  %v874_v3 = vld [vmem:[#allocation2] sm:$0xff]   ;;  %v876_v4 = vld [vmem:[#allocation2 + $0x8] sm:$0xff]   ;;  %v873_v5 = vld [vmem:[%s1233_s3 + $0x10] sm:$0xff]   ;;  %vm463_vm1 = vcmask 7168  }
  0x16   :  { %544 = vxpose.xlu0.c.b16.start [1/8] (narrow) %v871_v1, 16  ;;  %780 = vmatprep.subr.bf16.mxu1 %v874_v3  ;;  %v878_v6 = vld [vmem:[#allocation2 + $0x10] sm:$0xff]   ;;  %v875_v7 = vld [vmem:[%s1233_s3 + $0x18] sm:$0xff]   ;;  %v877_v9 = vld [vmem:[%s1233_s3 + $0x20] sm:$0xff]  }
  0x17   :  { %781 = vmatpush3.bf16.msra.mxu1 %v874_v3  ;;  %v880_v8 = vld [vmem:[#allocation2 + $0x18] sm:$0xff]   ;;  %v882_v10 = vld [vmem:[#allocation2 + $0x20] sm:$0xff]   ;;  %v38_v12 = vld [vmem:[%s1230_s0 + $0x8] sm:$0xff] }
  0x18   :  { %782 = vmatprep.subr.bf16.mxu1 %v876_v4  ;;  %v37_v11 = vld [vmem:[%s1230_s0] sm:$0xff]  ;;  %v879_v14 = vld [vmem:[%s1233_s3 + $0x28] sm:$0xff]   ;;  %v881_v16 = vld [vmem:[%s1233_s3 + $0x30] sm:$0xff]  }
  0x19   :  { %v1047_v13 = vpack.c.bf16 %v38_v12, %v37_v11  ;;  %v884_v15 = vld [vmem:[#allocation2 + $0x28] sm:$0xff]   ;;  %v39_v17 = vld [vmem:[%s1230_s0 + $0x10] sm:$0xff]  ;;  %v40_v18 = vld [vmem:[%s1230_s0 + $0x18] sm:$0xff] }
  0x1a   :  { %545 = vxpose.xlu0.c.b16.cont [2/8] (narrow) %v872_v2, 16  ;;  %v885_v19 = vld [vmem:[#allocation2 + $0x30] sm:$0xff]   ;;  %v1064_v20 = vpack.c.bf16 %v40_v18, %v39_v17  ;;  %v883_v21 = vld [vmem:[%s1233_s3 + $0x38] sm:$0xff]   ;;  %v41_v23 = vld [vmem:[%s1230_s0 + $0x20] sm:$0xff] }
  0x1b   :  { %783 = vmatpush3.bf16.msra.mxu1 %v876_v4  ;;  %845 = vmatpush3.bf16.xpose.msra.mxu0 %v1047_v13  ;;  %v886_v22 = vld [vmem:[#allocation2 + $0x38] sm:$0xff]   ;;  %v42_v24 = vld [vmem:[%s1230_s0 + $0x28] sm:$0xff]  ;;  %v887_v25 = vld [vmem:[%s1232_s2] sm:$0xff]  }
  0x1c   :  { %784 = vmatprep.subr.bf16.mxu1 %v878_v6  ;;  %796 = vmatprep.mubr.bf16.mxu1 %v1047_v13  ;;  %v55_v26 = vpack.c.bf16 %v42_v24, %v41_v23  ;;  %v888_v27 = vld [vmem:[%s1232_s2 + $0x8] sm:$0xff]   ;;  %v43_v28 = vld [vmem:[%s1230_s0 + $0x30] sm:$0xff]  ;;  %v44_v29 = vld [vmem:[%s1230_s0 + $0x38] sm:$0xff] }
  0x1d   :  { %846 = vmatprep.subr.bf16.mxu0 %v970_v0  ;;  %v889_v30 = vld [vmem:[%s1232_s2 + $0x10] sm:$0xff]   ;;  %v45_v31 = vld [vmem:[%s1230_s0 + $0x40] sm:$0xff]  ;;  %v46_v32 = vld [vmem:[%s1230_s0 + $0x48] sm:$0xff]  ;;  %v56_v33 = vpack.c.bf16 %v44_v29, %v43_v28 }
  0x1e   :  { %546 = vxpose.xlu0.c.b16.cont [3/8] (narrow) %v873_v5, 16  ;;  %v57_v34 = vpack.c.bf16 %v46_v32, %v45_v31  ;;  %v890_v35 = vld [vmem:[%s1232_s2 + $0x18] sm:$0xff]   ;;  %v47_v36 = vld [vmem:[%s1230_s0 + $0x50] sm:$0xff]  ;;  %v891_v38 = vld [vmem:[%s1232_s2 + $0x20] sm:$0xff]  }
  0x1f   :  { %785 = vmatpush3.bf16.msra.mxu1 %v878_v6  ;;  %v48_v37 = vld [vmem:[%s1230_s0 + $0x58] sm:$0xff]  ;;  %v49_v39 = vld [vmem:[%s1230_s0 + $0x60] sm:$0xff]  ;;  %v50_v40 = vld [vmem:[%s1230_s0 + $0x68] sm:$0xff] }
  0x20   :  { %786 = vmatprep.subr.bf16.mxu1 %v880_v8  ;;  %v58_v41 = vpack.c.bf16 %v48_v37, %v47_v36  ;;  %v59_v42 = vpack.c.bf16 %v50_v40, %v49_v39  ;;  %v892_v43 = vld [vmem:[%s1232_s2 + $0x28] sm:$0xff]   ;;  %v51_v44 = vld [vmem:[%s1230_s0 + $0x70] sm:$0xff]  ;;  %v52_v45 = vld [vmem:[%s1230_s0 + $0x78] sm:$0xff]  ;;  %s972_s0 = smov [#allocation5]  }
  0x21   :  { %v893_v46 = vld [vmem:[%s1232_s2 + $0x30] sm:$0xff]   ;;  %v60_v47 = vpack.c.bf16 %v52_v45, %v51_v44  ;;  %v894_v48 = vld [vmem:[%s1232_s2 + $0x38] sm:$0xff]   ;;  %s606_s2 = sshll.u32 %s972_s0, 4  ;;  %s607_s2 = int_to_ptr.vmem [resolvable:$true] %s606_s2 }
  0x22   :  { %547 = vxpose.xlu0.c.b16.cont [4/8] (narrow) %v875_v7, 16  ;;  %s917_s26 = scalar_lea.vmem %s607_s2, 1024  ;;  %p922_p9 = scmp.lt.s32.totalorder %s607_s2, %s607_s2 }
  0x23   :  { %787 = vmatpush3.bf16.msra.mxu1 %v880_v8  ;;  %847 = vmatpush3.bf16.xpose.msra.mxu0 %v1064_v20  ;;  %p918_p8 = scmp.ne.s32.totalorder %s607_s2, %s917_s26  ;;  %p923_p10 = scmp.lt.s32.totalorder %s917_s26, %s917_s26 }
  0x24   :  { %788 = vmatprep.subr.bf16.mxu1 %v882_v10  ;;  %848 = vmatprep.subr.bf16.mxu0 %v970_v0 }
  0x25   :  { %p924_p11 = por %p923_p10, %p922_p9 }
  0x26   :  { %548 = vxpose.xlu0.c.b16.cont [5/8] (narrow) %v877_v9, 16 }
  0x27   :  { %789 = vmatpush3.bf16.msra.mxu1 %v882_v10  ;;  %p925_p12 = pnand %p924_p11, %p918_p8 }
  0x28   :  { %790 = vmatprep.subr.bf16.mxu1 %v884_v15 }
  0x2a   :  { %549 = vxpose.xlu0.c.b16.cont [6/8] (narrow) %v879_v14, 16 }
  0x2b   :  { %791 = vmatpush3.bf16.msra.mxu1 %v884_v15  ;;  %849 = vmatpush3.bf16.xpose.msra.mxu0 %v55_v26 }
  0x2c   :  { %792 = vmatprep.subr.bf16.mxu1 %v885_v19  ;;  %850 = vmatprep.subr.bf16.mxu0 %v970_v0 }
  0x2e   :  { %550 = vxpose.xlu0.c.b16.cont [7/8] (narrow) %v881_v16, 16 }
  0x2f   :  { %793 = vmatpush3.bf16.msra.mxu1 %v885_v19 }
  0x30   :  { %794 = vmatprep.subr.bf16.mxu1 %v886_v22 }
  0x32   :  { %551 = vxpose.xlu0.c.b16.end [8/8] (narrow) %v883_v21, 16 }
  0x33   :  { %795 = vmatpush3.bf16.msra.mxu1 %v886_v22  ;;  %851 = vmatpush3.bf16.xpose.msra.mxu0 %v56_v33 }
  0x34   :  { %812 = vmatprep.subr.bf16.mxu1 %v887_v25  ;;  %852 = vmatprep.subr.bf16.mxu0 %v970_v0 }
  0x36   :  { %797 = vmatmul.mubr.bf16.vlgmr.msra.gmra.mrb[0].mxu1 %v1064_v20 }
  0x37   :  { %813 = vmatpush3.bf16.msra.mxu1 %v887_v25  ;;  %800 = vmatprep.mubr.bf16.mxu1 %v55_v26 }
  0x38   :  { %814 = vmatprep.subr.bf16.mxu1 %v888_v27 }
  0x3b   :  { %815 = vmatpush3.bf16.msra.mxu1 %v888_v27  ;;  %853 = vmatpush3.bf16.xpose.msra.mxu0 %v57_v34 }
  0x3c   :  { %816 = vmatprep.subr.bf16.mxu1 %v889_v30  ;;  %854 = vmatprep.subr.bf16.mxu0 %v970_v0 }
  0x3e   :  { %801 = vmatmul.mubr.bf16.gmra.mrb[4].mxu1 %v56_v33 }
  0x3f   :  { %817 = vmatpush3.bf16.msra.mxu1 %v889_v30  ;;  %804 = vmatprep.mubr.bf16.mxu1 %v57_v34 }
  0x40   :  { %818 = vmatprep.subr.bf16.mxu1 %v890_v35 }
  0x43   :  { %819 = vmatpush3.bf16.msra.mxu1 %v890_v35  ;;  %855 = vmatpush3.bf16.xpose.msra.mxu0 %v58_v41 }
  0x44   :  { %820 = vmatprep.subr.bf16.mxu1 %v891_v38  ;;  %856 = vmatprep.subr.bf16.mxu0 %v970_v0 }
  0x46   :  { %805 = vmatmul.mubr.bf16.gmra.mrb[8].mxu1 %v58_v41 }
  0x47   :  { %821 = vmatpush3.bf16.msra.mxu1 %v891_v38  ;;  %808 = vmatprep.mubr.bf16.mxu1 %v59_v42 }
  0x48   :  { %822 = vmatprep.subr.bf16.mxu1 %v892_v43 }
  0x4b   :  { %823 = vmatpush3.bf16.msra.mxu1 %v892_v43  ;;  %857 = vmatpush3.bf16.xpose.msra.mxu0 %v59_v42 }
  0x4c   :  { %824 = vmatprep.subr.bf16.mxu1 %v893_v46  ;;  %858 = vmatprep.subr.bf16.mxu0 %v970_v0 }
  0x4e   :  { %809 = vmatmul.mubr.bf16.gmra.mrb[12].mxu1 %v60_v47 }
  0x4f   :  { %825 = vmatpush3.bf16.msra.mxu1 %v893_v46  ;;  %828 = vmatprep.mubr.bf16.mxu1 %v1047_v13 }
  0x50   :  { %826 = vmatprep.subr.bf16.mxu1 %v894_v48 }
  0x53   :  { %827 = vmatpush3.bf16.msra.mxu1 %v894_v48  ;;  %859 = vmatpush3.bf16.xpose.msra.mxu0 %v60_v47 }
  0x56   :  { %829 = vmatmul.mubr.bf16.vlgmr.msra.gmra.mrb[16].mxu1 %v1064_v20 }
  0x57   :  { %832 = vmatprep.mubr.bf16.mxu1 %v55_v26 }
  0x5e   :  { %833 = vmatmul.mubr.bf16.gmra.mrb[20].mxu1 %v56_v33 }
  0x5f   :  { %836 = vmatprep.mubr.bf16.mxu1 %v57_v34 }
  0x66   :  { %837 = vmatmul.mubr.bf16.gmra.mrb[24].mxu1 %v58_v41 }
  0x67   :  { %840 = vmatprep.mubr.bf16.mxu1 %v59_v42 }
  0x6e   :  { %841 = vmatmul.mubr.bf16.gmra.mrb[28].mxu1 %v60_v47 }
  0x7c   :  { %v552_v49 = vpop.trf.xlu0 }
  0x7d   :  { %861 = vmatmul.mubr.bf16.vlgmr.msra.gmra.mrb[0].mxu0 %v552_v49 }
 0x109   :  { %v798_v50 = vpop.f32.mrb[0].mxu1 }
 0x10a   :  { %v159_v51 = vpop.f32.mrb[1].mxu1 }
 0x10b   :  { %v799_v52 = vpop.f32.mrb[2].mxu1 }
 0x10c   :  { %v700_v53 = vpack.c.bf16 %v799_v52, %v798_v50  ;;  %v162_v54 = vpop.f32.mrb[3].mxu1 }
 0x10d   :  { %v695_v55 = vpack.c.bf16 %v162_v54, %v159_v51 }
 0x10e   :  { %732 = vst [vmem:[#allocation5 + $0x8] sm:$0xff] %v700_v53  }
 0x10f   :  { %696 = vst [vmem:[#allocation5] sm:$0xff] %v695_v55  }
 0x111   :  { %v802_v56 = vpop.f32.mrb[4].mxu1 }
 0x112   :  { %v175_v57 = vpop.f32.mrb[5].mxu1 }
 0x113   :  { %v803_v58 = vpop.f32.mrb[6].mxu1 }
 0x114   :  { %v710_v59 = vpack.c.bf16 %v803_v58, %v802_v56  ;;  %v178_v60 = vpop.f32.mrb[7].mxu1 }
 0x115   :  { %v705_v61 = vpack.c.bf16 %v178_v60, %v175_v57 }
 0x116   :  { %734 = vst [vmem:[#allocation5 + $0x18] sm:$0xff] %v710_v59  }
 0x117   :  { %733 = vst [vmem:[#allocation5 + $0x10] sm:$0xff] %v705_v61  }
 0x119   :  { %v806_v62 = vpop.f32.mrb[8].mxu1 }
 0x11a   :  { %v191_v63 = vpop.f32.mrb[9].mxu1 }
 0x11b   :  { %v807_v0 = vpop.f32.mrb[10].mxu1 }
 0x11c   :  { %v720_v1 = vpack.c.bf16 %v807_v0, %v806_v62  ;;  %v194_v2 = vpop.f32.mrb[11].mxu1 }
 0x11d   :  { %v715_v3 = vpack.c.bf16 %v194_v2, %v191_v63 }
 0x11e   :  { %736 = vst [vmem:[#allocation5 + $0x28] sm:$0xff] %v720_v1  }
 0x11f   :  { %735 = vst [vmem:[#allocation5 + $0x20] sm:$0xff] %v715_v3  }
 0x121   :  { %v810_v4 = vpop.f32.mrb[12].mxu1 }
 0x122   :  { %v207_v5 = vpop.f32.mrb[13].mxu1 }
 0x123   :  { %v811_v6 = vpop.f32.mrb[14].mxu1 }
 0x124   :  { %v730_v7 = vpack.c.bf16 %v811_v6, %v810_v4  ;;  %v210_v8 = vpop.f32.mrb[15].mxu1 }
 0x125   :  { %v725_v9 = vpack.c.bf16 %v210_v8, %v207_v5 }
 0x126   :  { %738 = vst [vmem:[#allocation5 + $0x38] sm:$0xff] %v730_v7  }
 0x127   :  { %737 = vst [vmem:[#allocation5 + $0x30] sm:$0xff] %v725_v9  }
 0x128   :  { %928 = shalt.err (!%p925_p12)
}
 0x129   :  { %s929_s29 = scalar_lea.hbm %s1234_s4, 1024 }
 0x12a   :  { %p930_p13 = scmp.ne.s32.totalorder %s1234_s4, %s929_s29  ;;  %p933_p0 = scmp.lt.u32.totalorder %s929_s29, %s1234_s4 }
 0x12c   :  { %p935_p1 = pnand %p933_p0, %p930_p13 }
 0x12e   :  { %938 = shalt.err (!%p935_p1)
}
 0x12f   :  { %612 = dma.vmem_to_hbm [thread:$0]  %s607_s2, 1024, %s1234_s4, [#allocation4], %s968_s7, %s968_s7, %s969_s8   ;;  %v830_v10 = vpop.f32.mrb[16].mxu1 }
 0x130   :  { %466 = vst.msk [vmem:[%s1235_s5 + $0x10] sm:$0xff] %vm463_vm1, %v830_v10  ;;  %v400_v11 = vpop.f32.mrb[17].mxu1  ;;  %s973_s3 = smov [#allocation6]  }
 0x131   :  { %464 = vst.msk [vmem:[%s1235_s5] sm:$0xff] %vm463_vm1, %v400_v11  ;;  %v831_v12 = vpop.f32.mrb[18].mxu1  ;;  %s621_s16 = sshll.u32 %s973_s3, 4  ;;  %s622_s16 = int_to_ptr.vmem [resolvable:$true] %s621_s16 }
 0x132   :  { %467 = vst.msk [vmem:[%s1235_s5 + $0x18] sm:$0xff] %vm463_vm1, %v831_v12  ;;  %v403_v13 = vpop.f32.mrb[19].mxu1  ;;  %s939_s17 = scalar_lea.vmem %s622_s16, 16  ;;  %s943_s4 = scalar_lea.vmem %s622_s16, 32 }
 0x133   :  { %465 = vst.msk [vmem:[%s1235_s5 + $0x8] sm:$0xff] %vm463_vm1, %v403_v13  ;;  %v834_v14 = vpop.f32.mrb[20].mxu1  ;;  %p940_p2 = scmp.ne.s32.totalorder %s622_s16, %s939_s17  ;;  %p944_p3 = scmp.lt.s32.totalorder %s622_s16, %s622_s16 }
 0x134   :  { %470 = vst.msk [vmem:[%s1235_s5 + $0x30] sm:$0xff] %vm463_vm1, %v834_v14  ;;  %v416_v15 = vpop.f32.mrb[21].mxu1  ;;  %p945_p4 = scmp.lt.s32.totalorder %s943_s4, %s939_s17 }
 0x135   :  { %468 = vst.msk [vmem:[%s1235_s5 + $0x20] sm:$0xff] %vm463_vm1, %v416_v15  ;;  %v835_v16 = vpop.f32.mrb[22].mxu1 }
 0x136   :  { %471 = vst.msk [vmem:[%s1235_s5 + $0x38] sm:$0xff] %vm463_vm1, %v835_v16  ;;  %v419_v17 = vpop.f32.mrb[23].mxu1  ;;  %p946_p5 = por %p945_p4, %p944_p3 }
 0x137   :  { %469 = vst.msk [vmem:[%s1235_s5 + $0x28] sm:$0xff] %vm463_vm1, %v419_v17 }
 0x138   :  { %p947_p6 = pnand %p946_p5, %p940_p2 }
 0x139   :  { %v838_v18 = vpop.f32.mrb[24].mxu1 }
 0x13a   :  { %474 = vst.msk [vmem:[%s1235_s5 + $0x50] sm:$0xff] %vm463_vm1, %v838_v18  ;;  %v432_v19 = vpop.f32.mrb[25].mxu1 }
 0x13b   :  { %472 = vst.msk [vmem:[%s1235_s5 + $0x40] sm:$0xff] %vm463_vm1, %v432_v19  ;;  %v839_v20 = vpop.f32.mrb[26].mxu1 }
 0x13c   :  { %475 = vst.msk [vmem:[%s1235_s5 + $0x58] sm:$0xff] %vm463_vm1, %v839_v20  ;;  %v435_v21 = vpop.f32.mrb[27].mxu1 }
 0x13d   :  { %473 = vst.msk [vmem:[%s1235_s5 + $0x48] sm:$0xff] %vm463_vm1, %v435_v21 }
 0x141   :  { %v842_v22 = vpop.f32.mrb[28].mxu1 }
 0x142   :  { %478 = vst.msk [vmem:[%s1235_s5 + $0x70] sm:$0xff] %vm463_vm1, %v842_v22  ;;  %v448_v23 = vpop.f32.mrb[29].mxu1 }
 0x143   :  { %476 = vst.msk [vmem:[%s1235_s5 + $0x60] sm:$0xff] %vm463_vm1, %v448_v23  ;;  %v843_v24 = vpop.f32.mrb[30].mxu1 }
 0x144   :  { %479 = vst.msk [vmem:[%s1235_s5 + $0x78] sm:$0xff] %vm463_vm1, %v843_v24  ;;  %v451_v25 = vpop.f32.mrb[31].mxu1 }
 0x145   :  { %477 = vst.msk [vmem:[%s1235_s5 + $0x68] sm:$0xff] %vm463_vm1, %v451_v25 }
 0x150   :  { %v594_v26 = vpop.f32.mrb[0].mxu0 }
 0x151   :  { %600 = vst [vmem:[#allocation6] sm:$0x1] %v594_v26  ;;  %v862_v27 = vpop.f32.mrb[1].mxu0 }
 0x152   :  { %v597_v28 = vpop.f32.mrb[2].mxu0 }
 0x153   :  { %950 = shalt.err (!%p947_p6)
}
 0x154   :  { %s951_s18 = scalar_lea.hbm %s1236_s6, 16 }
 0x155   :  { %p952_p7 = scmp.ne.s32.totalorder %s1236_s6, %s951_s18  ;;  %p955_p8 = scmp.lt.u32.totalorder %s951_s18, %s1236_s6 }
 0x157   :  { %p957_p9 = pnand %p955_p8, %p952_p7 }
 0x159   :  { %960 = shalt.err (!%p957_p9)
}
 0x15a   :  { %624 = dma.vmem_to_hbm [thread:$0]  %s622_s16, 16, %s1236_s6, [#allocation7]   ;;  %v863_v29 = vpop.f32.mrb[3].mxu0 }
 0x15b   :  { %963 = dma.done.wait [#allocation4], 1024  }
 0x15c   :  { %964 = vsyncadd [#allocation4], 4294966272 }
 0x15d   :  { %965 = dma.done.wait [#allocation7], 16  }
 0x15e   :  { %966 = vsyncadd [#allocation7], 4294967280 }
 0x15f   :  { %633 = vsyncpa [#allocation3], 1 }
 0x160   :  { %634 = vsyncpa [#allocation4], 1 }
 0x161   :  { %635 = vsyncpa [#allocation7], 1 }

</bundles_post_ra>
